<compile_context>
chip_gen: v7x
topology: tpu7x:2x2x1
jax: 0.10.0
libtpu: 0.0.40
codegen_flags: <defaults>
</compile_context>

<pallas_src>
import math

import jax
import jax.numpy as jnp
from jax.experimental import pallas as pl
from jax.experimental.pallas import tpu as pltpu


# ----------------------------------------------------------------------------
# Tile selection
# ----------------------------------------------------------------------------
def _pick_divisor_tile(dim, target, multiple):
    """Largest divisor of `dim` that is a multiple of `multiple` and <= target.
    Returns None when no such divisor exists (caller falls back to the full
    dim, which is always a legal block size)."""
    if dim % multiple == 0 and dim <= target:
        return dim
    t = (min(dim, target) // multiple) * multiple
    while t >= multiple:
        if dim % t == 0:
            return t
        t -= multiple
    return None


def _select_tiles(B, N, F, fNew, x_bytes, out_bytes, *,
                  tile_cols, tile_nodes_out, tile_nodes_src,
                  vmem_budget=36 * 1024 * 1024):
    # Source-node (reduction) tile: lane dim of the A block -> multiple of 128
    # or the full node dim (always legal).
    tm = _pick_divisor_tile(N, tile_nodes_src, 128) or N
    # Output-node tile: sublane dim of the A / out / bias blocks -> multiple of 8.
    tn = _pick_divisor_tile(N, tile_nodes_out, 8) or N
    # Batch tile: TB is the sublane dim of the x block (multiple of 8) and
    # TB*fNew is the lane dim of the out/bias blocks (multiple of 128), unless
    # TB covers the whole batch (full dims are always legal).
    lane_mult = 128 // math.gcd(fNew, 128)
    tb_mult = 8 * lane_mult // math.gcd(8, lane_mult)
    tb = _pick_divisor_tile(B, max(tb_mult, tile_cols // max(fNew, 1)), tb_mult) or B

    def footprint(tb_, tn_, tm_):
        cols = tb_ * fNew
        return (2 * tm_ * tb_ * F * x_bytes        # x block (double buffered)
                + 2 * tm_ * F * fNew * 4           # W block
                + 2 * tn_ * tm_ * 4                # A block
                + 2 * tn_ * cols * 4               # pre-tiled bias block
                + 2 * tn_ * cols * out_bytes       # output block
                + tn_ * cols * 4                   # f32 accumulator scratch
                + 2 * tm_ * cols * 4)              # in-kernel h (+ flatten copy)

    # Shrink the free dims until the conservative estimate fits the budget
    # (sized for v7x's 64 MiB VMEM; v5e/v6e have 128 MiB).
    while footprint(tb, tn, tm) > vmem_budget:
        if tb > tb_mult and (t := _pick_divisor_tile(B, tb // 2, tb_mult)):
            tb = t
        elif tn > 8 and (t := _pick_divisor_tile(N, tn // 2, 8)):
            tn = t
        elif tm > 128 and (t := _pick_divisor_tile(N, tm // 2, 128)):
            tm = t
        else:
            break  # pathological shape; see the padding TODO above
    return tb, tn, tm


# ----------------------------------------------------------------------------
# Fused kernel bodies
# ----------------------------------------------------------------------------
def _transform_tile(x_ref, w_ref):
    """Per-node feature transform for the current (source-node, batch) tile,
    returned as the lane-dense f32 slab h[(m), (b, k)]."""
    # x_ref: (TM, TB, F) node-major input; w_ref: (TM, F, fNew) per-node W.
    h = jnp.einsum("mbf,mfk->mbk", x_ref[...], w_ref[...],
                   preferred_element_type=jnp.float32)   # batched MXU matmul
    tm, tb, k = h.shape
    return h.reshape(tm, tb * k)                         # minor-dim merge


def _gcnn_kernel_single(x_ref, w_ref, a_ref, bias_ref, o_ref):
    # Whole source-node axis in one tile: no accumulator scratch round trip.
    h_flat = _transform_tile(x_ref, w_ref)
    out = jnp.dot(a_ref[...], h_flat, preferred_element_type=jnp.float32)
    o_ref[...] = (out + bias_ref[...]).astype(o_ref.dtype)


def _gcnn_kernel_multi(x_ref, w_ref, a_ref, bias_ref, o_ref, acc_ref):
    m = pl.program_id(2)

    @pl.when(m == 0)
    def _():
        acc_ref[...] = jnp.zeros_like(acc_ref)

    h_flat = _transform_tile(x_ref, w_ref)
    acc_ref[...] += jnp.dot(a_ref[...], h_flat,
                            preferred_element_type=jnp.float32)

    @pl.when(m == pl.num_programs(2) - 1)
    def _():
        o_ref[...] = (acc_ref[...] + bias_ref[...]).astype(o_ref.dtype)


# ----------------------------------------------------------------------------
# Forward wrapper (layout plumbing lives here, compute lives in the kernel)
# ----------------------------------------------------------------------------
def gcnn_forward(x, w, a, bias, *, tile_cols=2048, tile_nodes_out=512,
                 tile_nodes_src=512):
    """x: [B, N, F], w: [N, F, fNew], a: [N, N] dense adjacency, bias: [N, fNew]."""
    B, N, F = x.shape
    fNew = w.shape[-1]
    out_dtype = jnp.result_type(x.dtype, w.dtype, a.dtype, bias.dtype)

    TB, TN, TM = _select_tiles(
        B, N, F, fNew,
        jnp.dtype(x.dtype).itemsize, jnp.dtype(out_dtype).itemsize,
        tile_cols=tile_cols, tile_nodes_out=tile_nodes_out,
        tile_nodes_src=tile_nodes_src)
    gn, gb, gm = N // TN, B // TB, N // TM
    cols = TB * fNew

    # Node-major input (one XLA transpose; see TODO above) and a bias slab
    # pre-tiled over one batch tile so the kernel's final step is a plain add.
    x_nbf = jnp.transpose(x, (1, 0, 2))                       # [N, B, F]
    bias_t = jnp.tile(bias.astype(jnp.float32), (1, TB))      # [N, TB*fNew]

    in_specs = [
        pl.BlockSpec((TM, TB, F), lambda n, b, m: (m, b, 0)),      # x (node-major)
        pl.BlockSpec((TM, F, fNew), lambda n, b, m: (m, 0, 0)),    # W (per-node)
        pl.BlockSpec((TN, TM), lambda n, b, m: (n, m)),            # A
        pl.BlockSpec((TN, cols), lambda n, b, m: (n, 0)),          # bias slab
    ]
    out_spec = pl.BlockSpec((TN, cols), lambda n, b, m: (n, b))    # lane-dense

    if gm == 1:
        kernel, scratch = _gcnn_kernel_single, []
    else:
        kernel = _gcnn_kernel_multi
        scratch = [pltpu.VMEM((TN, cols), jnp.float32)]

    y_flat = pl.pallas_call(
        kernel,
        out_shape=jax.ShapeDtypeStruct((N, B * fNew), out_dtype),
        grid=(gn, gb, gm),
        in_specs=in_specs,
        out_specs=out_spec,
        scratch_shapes=scratch,
        compiler_params=pltpu.CompilerParams(
            # n/b are megacore-shardable; m is the source-node reduction axis.
            dimension_semantics=("parallel", "parallel", "arbitrary"),
            vmem_limit_bytes=48 * 1024 * 1024),
    )(x_nbf, w, a, bias_t)

    # Wrapper-side layout plumbing only: [N, B*fNew] -> [B, N, fNew].
    return jnp.transpose(y_flat.reshape(N, B, fNew), (1, 0, 2))


# ----------------------------------------------------------------------------
# Reference + self-test
# ----------------------------------------------------------------------------
def gcnn_reference(x, w, a, bias):
    h = jnp.einsum("bnf,nfk->bnk", x, w, precision="highest")
    out = jnp.einsum("nm,bmk->bnk", a, h, precision="highest")
    return out + bias[None]


def _ring_adjacency(n):
    # Deterministic dense adjacency (ring + self loops, row-normalized); stands
    # in for the sparse matrix A (torch.sparse.mm computes the same product).
    eye = jnp.eye(n, dtype=jnp.float32)
    ring = jnp.roll(eye, 1, axis=1) + jnp.roll(eye, -1, axis=1)
    adj = eye + ring
    return adj / jnp.sum(adj, axis=1, keepdims=True)


def _run_case(key, batch, num_nodes, f_old, f_new, forward_fn):
    kx, kw, kb = jax.random.split(key, 3)
    scale = 0.1  # denseInitializerScale; init mimics normal_(mean=-1, std=1)*scale
    w = (jax.random.normal(kw, (num_nodes, f_old, f_new), jnp.float32) - 1.0) * scale
    bias = (jax.random.normal(kb, (num_nodes, f_new), jnp.float32) - 1.0) * scale
    a = _ring_adjacency(num_nodes)
    x = jax.random.normal(kx, (batch, num_nodes, f_old), jnp.float32)

    y = jax.block_until_ready(forward_fn(x, w, a, bias))
    y_ref = gcnn_reference(x, w, a, bias)
    assert y.shape == (batch, num_nodes, f_new)
    # Tolerance covers MXU pass-precision differences vs the XLA reference.
    assert jnp.allclose(y, y_ref, atol=2e-2, rtol=2e-2), float(
        jnp.max(jnp.abs(y - y_ref)))


if __name__ == "__main__":
    key = jax.random.PRNGKey(0)
    k1, k2 = jax.random.split(key)

    # Default GCNNOperator-sized case (single source-node tile, no scratch).
    _run_case(k1, batch=2, num_nodes=8, f_old=16, f_new=32,
              forward_fn=jax.jit(gcnn_forward))

    # Slightly larger case with forced small node tiles to exercise the
    # multi-tile reduction (accumulator) path and multi-block parallel axes.
    forced = jax.jit(lambda x, w, a, b: gcnn_forward(
        x, w, a, b, tile_nodes_out=128, tile_nodes_src=128))
    _run_case(k2, batch=8, num_nodes=256, f_old=16, f_new=32, forward_fn=forced)

    print("KERNEL_OK")
</pallas_src>

<mosaic_0001>
module attributes {stable_mosaic.version = 11 : i64} {
  func.func @_gcnn_kernel_single(%arg0: i32, %arg1: i32, %arg2: i32, %arg3: memref<8x2x16xf32, #tpu.memory_space<vmem>>, %arg4: memref<8x16x32xf32, #tpu.memory_space<vmem>>, %arg5: memref<8x8xf32, #tpu.memory_space<vmem>>, %arg6: memref<8x64xf32, #tpu.memory_space<vmem>>, %arg7: memref<8x64xf32, #tpu.memory_space<vmem>>) attributes {dimension_semantics = [#tpu.dimension_semantics<parallel>, #tpu.dimension_semantics<parallel>, #tpu.dimension_semantics<arbitrary>], iteration_bounds = array<i64: 1, 1, 1>, scalar_prefetch = 0 : i64, scratch_operands = 0 : i64, tpu.core_type = #tpu.core_type<tc>, window_params = [{transform_indices = @transform_0, window_bounds = array<i64: 8, 2, 16>}, {transform_indices = @transform_1, window_bounds = array<i64: 8, 16, 32>}, {transform_indices = @transform_2, window_bounds = array<i64: 8, 8>}, {transform_indices = @transform_3, window_bounds = array<i64: 8, 64>}, {transform_indices = @transform_4, window_bounds = array<i64: 8, 64>}]} {
    %c0 = arith.constant 0 : index
    %c0_0 = arith.constant 0 : index
    %c0_1 = arith.constant 0 : index
    %0 = vector.load %arg3[%c0, %c0_0, %c0_1] : memref<8x2x16xf32, #tpu.memory_space<vmem>>, vector<8x2x16xf32>
    %c0_2 = arith.constant 0 : index
    %c0_3 = arith.constant 0 : index
    %c0_4 = arith.constant 0 : index
    %1 = vector.load %arg4[%c0_2, %c0_3, %c0_4] : memref<8x16x32xf32, #tpu.memory_space<vmem>>, vector<8x16x32xf32>
    "tpu.trace_start"() <{level = 10 : i32, message = "mbf,mfk->mbk"}> : () -> ()
    %cst = arith.constant dense<0.000000e+00> : vector<8x2x32xf32>
    %2 = tpu.matmul %0, %1, %cst {dimension_numbers = #tpu.dot_dimension_numbers<[2], [1], [1], [2], [0, 0, 0, 1, 1, 2], [0], [0]>} : vector<8x2x16xf32>, vector<8x16x32xf32>, vector<8x2x32xf32> -> vector<8x2x32xf32>
    "tpu.trace_stop"() : () -> ()
    %3 = vector.shape_cast %2 : vector<8x2x32xf32> to vector<8x64xf32>
    %c0_5 = arith.constant 0 : index
    %c0_6 = arith.constant 0 : index
    %4 = vector.load %arg5[%c0_5, %c0_6] : memref<8x8xf32, #tpu.memory_space<vmem>>, vector<8x8xf32>
    %cst_7 = arith.constant dense<0.000000e+00> : vector<8x64xf32>
    %5 = tpu.matmul %4, %3, %cst_7 {dimension_numbers = #tpu.dot_dimension_numbers<[1], [0], [0], [1], [0, 0, 1, 1], [], []>} : vector<8x8xf32>, vector<8x64xf32>, vector<8x64xf32> -> vector<8x64xf32>
    %c0_8 = arith.constant 0 : index
    %c0_9 = arith.constant 0 : index
    %6 = vector.load %arg6[%c0_8, %c0_9] : memref<8x64xf32, #tpu.memory_space<vmem>>, vector<8x64xf32>
    %7 = arith.addf %5, %6 : vector<8x64xf32>
    %c0_10 = arith.constant 0 : index
    %c0_11 = arith.constant 0 : index
    %8 = vector.load %arg7[%c0_10, %c0_11] : memref<8x64xf32, #tpu.memory_space<vmem>>, vector<8x64xf32>
    tpu.vector_store %arg7[%c0_10, %c0_11], %7 {strides = array<i32>} : memref<8x64xf32, #tpu.memory_space<vmem>>, vector<8x64xf32>,
    return
  }
  func.func @transform_0(%arg0: i32, %arg1: i32, %arg2: i32) -> (i32, i32, i32) {
    %c0_i32 = arith.constant 0 : i32
    %c0_i32_0 = arith.constant 0 : i32
    return %arg2, %arg1, %c0_i32 : i32, i32, i32
  }
  func.func @transform_1(%arg0: i32, %arg1: i32, %arg2: i32) -> (i32, i32, i32) {
    %c0_i32 = arith.constant 0 : i32
    %c0_i32_0 = arith.constant 0 : i32
    %c0_i32_1 = arith.constant 0 : i32
    return %arg2, %c0_i32, %c0_i32_0 : i32, i32, i32
  }
  func.func @transform_2(%arg0: i32, %arg1: i32, %arg2: i32) -> (i32, i32) {
    %c0_i32 = arith.constant 0 : i32
    return %arg0, %arg2 : i32, i32
  }
  func.func @transform_3(%arg0: i32, %arg1: i32, %arg2: i32) -> (i32, i32) {
    %c0_i32 = arith.constant 0 : i32
    %c0_i32_0 = arith.constant 0 : i32
    return %arg0, %c0_i32 : i32, i32
  }
  func.func @transform_4(%arg0: i32, %arg1: i32, %arg2: i32) -> (i32, i32) {
    %c0_i32 = arith.constant 0 : i32
    return %arg0, %arg1 : i32, i32
  }
}

</mosaic_0001>

<bundles_post_ra>
// kernel: tile.9
= control target key start
LH: loop header
LB: loop body
LE: loop exit
PB: predicated region body
PF: predicated region fallthrough
CT: control target
= control target key end

     0   :  { %vm42_vm0 = vcmask 1047556   ;;  %vm44_vm1 = vcmask 261120   ;;  %vm54_vm2 = vcmask 523520   ;;  %s111_s0 = inlined_call_operand.vmem [shape: f32[8,2,32], index: 0, kind: input, shape index: {}]   ;;  %s112_s1 = inlined_call_operand.vmem [shape: f32[8,64], index: 1, kind: output, shape index: {}]  }
   0x1   :  { %v62_v0 = vld [vmem:[%s111_s0 + $0xe] sm:$0x3]  ;;  %v63_v1 = vld [vmem:[%s111_s0 + $0xc] sm:$0x3]  ;;  %v64_v2 = vld [vmem:[%s111_s0 + $0xa] sm:$0x3] }
   0x2   :  { %8 = vst [vmem:[#allocation0 + $0x38] sm:$0x3] %v62_v0  ;;  %13 = vst [vmem:[#allocation0 + $0x30] sm:$0x3] %v63_v1  ;;  %v65_v3 = vld [vmem:[%s111_s0 + $0x8] sm:$0x3] }
   0x3   :  { %18 = vst [vmem:[#allocation0 + $0x28] sm:$0x3] %v64_v2  ;;  %v66_v4 = vld [vmem:[%s111_s0 + $0x6] sm:$0x3]  ;;  %v67_v5 = vld [vmem:[%s111_s0 + $0x4] sm:$0x3] }
   0x4   :  { %23 = vst [vmem:[#allocation0 + $0x20] sm:$0x3] %v65_v3  ;;  %28 = vst [vmem:[#allocation0 + $0x18] sm:$0x3] %v66_v4  ;;  %v68_v6 = vld [vmem:[%s111_s0 + $0x2] sm:$0x3] }
   0x5   :  { %33 = vst [vmem:[#allocation0 + $0x10] sm:$0x3] %v67_v5  ;;  %v38_v7 = vld [vmem:[%s111_s0] sm:$0x3]  ;;  %37 = vst [vmem:[#allocation0 + $0x8] sm:$0x3] %v68_v6 }
   0x6   :  { %39 = vst [vmem:[#allocation0] sm:$0x3] %v38_v7  ;;  %s70_s0 = smov 32  }
   0xb   :  { %v41_v8 = vld [vmem:[#allocation0] ss:$8 sm:$0xf0]   ;;  %v49_v9 = vld [vmem:[#allocation0 + $0x1] ss:$8 sm:$0xf0]  }
   0xd   :  { %v40_v10 = vld [vmem:[#allocation0] ss:$8 sm:$0xf]   ;;  %v47_v11 = vld [vmem:[#allocation0 + $0x1] ss:$8 sm:$0xf]  }
   0xe   :  { %v43_v12 = vsel %vm42_vm0, %v41_v8, %v40_v10  ;;  %v51_v13 = vsel %vm42_vm0, %v49_v9, %v47_v11 }
   0xf   :  { %52 = vrot.lane.b32.xlu0 %v51_v13, %s70_s0  ;;  %45 = vst.msk [vmem:[%s112_s1] sm:$0xff] %vm44_vm1, %v43_v12  }
  0x81   :  { %v53_v14 = vpop.permute.xlu0 %52  }
  0x82   :  { %55 = vst.msk [vmem:[%s112_s1] sm:$0xff] %vm54_vm2, %v53_v14  }

// kernel: gcnn_forward.1
= control target key start
LH: loop header
LB: loop body
LE: loop exit
PB: predicated region body
PF: predicated region fallthrough
CT: control target
= control target key end

     0   :  { %9 = vsyncpa [#allocation3], 0  ;;  %s932_s15 = smov [#allocation2]   ;;  %s1038_s0 = inlined_call_operand.vmem [shape: f32[8,2,16], index: 0, kind: input, shape index: {}]   ;;  %s1039_s1 = inlined_call_operand.hbm [shape: f32[8,16,32], index: 1, kind: input, shape index: {}]   ;;  %s1040_s2 = inlined_call_operand.vmem [shape: f32[8,8], index: 2, kind: input, shape index: {}]   ;;  %s1041_s3 = inlined_call_operand.vmem [shape: f32[8,64], index: 3, kind: input, shape index: {}]   ;;  %s1042_s4 = inlined_call_operand.vmem [shape: f32[8,64], index: 4, kind: output, shape index: {}]  }
   0x1   :  { %s17_s16 = sshll.u32 %s932_s15, 4  ;;  %s908_s19 = scalar_lea.hbm %s1039_s1, 2048  ;;  %s18_s16 = int_to_ptr.vmem [resolvable:$true] %s17_s16 }
   0x2   :  { %p909_p0 = scmp.ne.s32.totalorder %s1039_s1, %s908_s19  ;;  %p912_p1 = scmp.lt.u32.totalorder %s908_s19, %s1039_s1 }
   0x4   :  { %p914_p2 = pnand %p912_p1, %p909_p0 }
   0x6   :  { %917 = shalt.err (!%p914_p2)
}
   0x7   :  { %s918_s24 = scalar_lea.vmem %s18_s16, 2048  ;;  %p923_p4 = scmp.lt.s32.totalorder %s18_s16, %s18_s16 }
   0x8   :  { %p919_p3 = scmp.ne.s32.totalorder %s18_s16, %s918_s24  ;;  %p924_p5 = scmp.lt.s32.totalorder %s918_s24, %s918_s24 }
   0xa   :  { %p925_p6 = por %p924_p5, %p923_p4 }
   0xc   :  { %p926_p7 = pnand %p925_p6, %p919_p3 }
   0xe   :  { %929 = shalt.err (!%p926_p7)
}
   0xf   :  { %s933_s25 = smov 128   ;;  %s934_s26 = smov 8  }
  0x10   :  { %23 = dma.hbm_to_vmem [thread:$0]  %s1039_s1, 2048, %s18_s16, [#allocation3], %s933_s25, %s933_s25, %s934_s26  }
  0x11   :  { %930 = dma.done.wait [#allocation3], 2048  }
  0x12   :  { %931 = vsyncadd [#allocation3], 4294965248  ;;  %v935_v0 = vmov 0.0|0.0   ;;  %vm936_vm0 = vmmov 0   ;;  %v937_v1 = vmov 0.0   ;;  %v39_v2 = vld [vmem:[#allocation2] sm:$0xff]  ;;  %v644_v36 = vlaneseq }
  0x13   :  { %875 = vmatprep.subr.bf16.mxu0 %v935_v0  ;;  %878 = vmatprep.subr.bf16.mxu1 %v935_v0  ;;  %v40_v3 = vld [vmem:[#allocation2 + $0x8] sm:$0xff]  ;;  %v41_v4 = vld [vmem:[#allocation2 + $0x10] sm:$0xff]  ;;  %v42_v6 = vld [vmem:[#allocation2 + $0x18] sm:$0xff]  ;;  %vm55_vm1 = vcmask 130048   ;;  %v938_v34 = vmov 1983009808  }
  0x14   :  { %818 = vmatprep.mubr.msk.f32.mxu0 %vm936_vm0, %v937_v1  ;;  %825 = vmatprep.mubr.msk.f32.mxu1 %vm936_vm0, %v937_v1  ;;  %v876_v5 = vpack.c.bf16 %v40_v3, %v39_v2  ;;  %v879_v7 = vpack.c.bf16 %v42_v6, %v41_v4  ;;  %v43_v8 = vld [vmem:[#allocation2 + $0x20] sm:$0xff]  ;;  %v44_v9 = vld [vmem:[#allocation2 + $0x28] sm:$0xff]  ;;  %v45_v10 = vld [vmem:[#allocation2 + $0x30] sm:$0xff]  ;;  %v642_v35 = vunpack.c.l.s4 %v938_v34  ;;  %v645_v38 = vshrl.u32 %v644_v36, 7 }
  0x15   :  { %v31_v11 = vld [vmem:[%s1038_s0] sm:$0x3]  ;;  %v882_v12 = vpack.c.bf16 %v44_v9, %v43_v8  ;;  %v46_v13 = vld [vmem:[#allocation2 + $0x38] sm:$0xff]  ;;  %v32_v14 = vld [vmem:[%s1038_s0 + $0x2] sm:$0x3]  ;;  %vm694_vm2 = vcmask 261120  }
  0x16   :  { %877 = vmatpush3.bf16.msra.mxu0 %v876_v5  ;;  %880 = vmatpush3.bf16.msra.mxu1 %v879_v7  ;;  %v885_v15 = vpack.c.bf16 %v46_v13, %v45_v10  ;;  %v47_v16 = vld [vmem:[#allocation2 + $0x40] sm:$0xff]  ;;  %v48_v17 = vld [vmem:[#allocation2 + $0x48] sm:$0xff]  ;;  %v49_v18 = vld [vmem:[#allocation2 + $0x50] sm:$0xff]  ;;  %v643_v37 = vunpack.c.0.s8 %v642_v35  ;;  %v939_v53 = vmov 1934713408   ;;  %vm698_vm3 = vcmask 64512  }
  0x17   :  { %881 = vmatprep.subr.bf16.mxu0 %v935_v0  ;;  %884 = vmatprep.subr.bf16.mxu1 %v935_v0  ;;  %v50_v19 = vld [vmem:[#allocation2 + $0x58] sm:$0xff]  ;;  %v33_v20 = vld [vmem:[%s1038_s0 + $0x4] sm:$0x3]  ;;  %v888_v21 = vpack.c.bf16 %v48_v17, %v47_v16  ;;  %v34_v22 = vld [vmem:[%s1038_s0 + $0x6] sm:$0x3]  ;;  %v674_v54 = vunpack.c.l.s4 %v939_v53  ;;  %vm772_vm4 = vcmask 523264  }
  0x18   :  { %v891_v23 = vpack.c.bf16 %v50_v19, %v49_v18  ;;  %v51_v24 = vld [vmem:[#allocation2 + $0x60] sm:$0xff]  ;;  %v52_v25 = vld [vmem:[#allocation2 + $0x68] sm:$0xff]  ;;  %v53_v26 = vld [vmem:[#allocation2 + $0x70] sm:$0xff]  ;;  %v646_v43 = vsub.s32 %v643_v37, %v645_v38 }
  0x19   :  { %819 = vmatmul.mubr.msk.f32.vlgmr.msra.gmra.mrb[0].mxu0 %vm55_vm1, %v31_v11  ;;  %826 = vmatmul.mubr.msk.f32.vlgmr.msra.gmra.mrb[0].mxu1 %vm55_vm1, %v32_v14  ;;  %v54_v27 = vld [vmem:[#allocation2 + $0x78] sm:$0xff]  ;;  %v35_v28 = vld [vmem:[%s1038_s0 + $0x8] sm:$0x3]  ;;  %v894_v29 = vpack.c.bf16 %v52_v25, %v51_v24  ;;  %v36_v30 = vld [vmem:[%s1038_s0 + $0xa] sm:$0x3]  ;;  %v675_v60 = vunpack.c.0.s8 %v674_v54 }
  0x1a   :  { %883 = vmatpush3.bf16.msra.mxu0 %v882_v12  ;;  %886 = vmatpush3.bf16.msra.mxu1 %v885_v15  ;;  %v897_v31 = vpack.c.bf16 %v54_v27, %v53_v26  ;;  %v37_v32 = vld [vmem:[%s1038_s0 + $0xc] sm:$0x3]  ;;  %v38_v33 = vld [vmem:[%s1038_s0 + $0xe] sm:$0x3]  ;;  %s940_s0 = smov 32   ;;  %v696_v11 = vld [vmem:[%s1040_s2] sm:$0xff] }
  0x1b   :  { %832 = vmatprep.mubr.msk.f32.mxu0 %vm936_vm0, %v937_v1  ;;  %839 = vmatprep.mubr.msk.f32.mxu1 %vm936_vm0, %v937_v1  ;;  %v678_v4 = vsub.s32 %v675_v60, %v645_v38  ;;  %v697_v13 = vld [vmem:[%s1041_s3] sm:$0xff] }
  0x1c   :  { %887 = vmatprep.subr.bf16.mxu0 %v935_v0  ;;  %890 = vmatprep.subr.bf16.mxu1 %v935_v0 }
  0x1d   :  { %833 = vmatmul.mubr.msk.f32.vlgmr.msra.gmra.mrb[2].mxu0 %vm55_vm1, %v33_v20  ;;  %840 = vmatmul.mubr.msk.f32.vlgmr.msra.gmra.mrb[2].mxu1 %vm55_vm1, %v34_v22 }
  0x1e   :  { %889 = vmatpush3.bf16.msra.mxu0 %v888_v21  ;;  %892 = vmatpush3.bf16.msra.mxu1 %v891_v23 }
  0x1f   :  { %846 = vmatprep.mubr.msk.f32.mxu0 %vm936_vm0, %v937_v1  ;;  %853 = vmatprep.mubr.msk.f32.mxu1 %vm936_vm0, %v937_v1 }
  0x20   :  { %893 = vmatprep.subr.bf16.mxu0 %v935_v0  ;;  %896 = vmatprep.subr.bf16.mxu1 %v935_v0 }
  0x21   :  { %847 = vmatmul.mubr.msk.f32.vlgmr.msra.gmra.mrb[4].mxu0 %vm55_vm1, %v35_v28  ;;  %854 = vmatmul.mubr.msk.f32.vlgmr.msra.gmra.mrb[4].mxu1 %vm55_vm1, %v36_v30 }
  0x22   :  { %895 = vmatpush3.bf16.msra.mxu0 %v894_v29  ;;  %898 = vmatpush3.bf16.msra.mxu1 %v897_v31 }
  0x23   :  { %860 = vmatprep.mubr.msk.f32.mxu0 %vm936_vm0, %v937_v1  ;;  %867 = vmatprep.mubr.msk.f32.mxu1 %vm936_vm0, %v937_v1 }
  0x24   :  { %870 = vmatprep.subr.mxu0 %v937_v1 }
  0x25   :  { %861 = vmatmul.mubr.msk.f32.vlgmr.msra.gmra.mrb[6].mxu0 %vm55_vm1, %v37_v32  ;;  %868 = vmatmul.mubr.msk.f32.vlgmr.msra.gmra.mrb[6].mxu1 %vm55_vm1, %v38_v33 }
  0x26   :  { %872 = vmatprep.mubr.msk.f32.mxu0 %vm936_vm0, %v937_v1 }
  0xec   :  { %v125_v39 = vpop.f32.mrb[0].mxu0  ;;  %v198_v40 = vpop.f32.mrb[0].mxu1 }
  0xed   :  { %v820_v41 = vpop.f32.mrb[1].mxu0  ;;  %v827_v42 = vpop.f32.mrb[1].mxu1 }
  0xf0   :  { %v271_v44 = vpop.f32.mrb[2].mxu0  ;;  %v344_v46 = vpop.f32.mrb[2].mxu1 }
  0xf1   :  { %v640_v45 = vcombine.low %v125_v39, %v271_v44  ;;  %v834_v47 = vpop.f32.mrb[3].mxu0  ;;  %v648_v48 = vcombine.low %v198_v40, %v344_v46  ;;  %v841_v49 = vpop.f32.mrb[3].mxu1 }
  0xf3   :  { %v647_v50 = vrot.slane %v640_v45, %v646_v43  ;;  %v655_v51 = vrot.slane %v648_v48, %v646_v43 }
  0xf4   :  { %v417_v52 = vpop.f32.mrb[4].mxu0  ;;  %v490_v55 = vpop.f32.mrb[4].mxu1 }
  0xf5   :  { %v848_v56 = vpop.f32.mrb[5].mxu0  ;;  %v672_v57 = vcombine.low %v647_v50, %v655_v51  ;;  %v855_v58 = vpop.f32.mrb[5].mxu1 }
  0xf7   :  { %v679_v6 = vrot.slane %v672_v57, %v678_v4 }
  0xf8   :  { %v563_v59 = vpop.f32.mrb[6].mxu0  ;;  %v636_v62 = vpop.f32.mrb[6].mxu1 }
  0xf9   :  { %v656_v61 = vcombine.low %v417_v52, %v563_v59  ;;  %v862_v63 = vpop.f32.mrb[7].mxu0  ;;  %v664_v0 = vcombine.low %v490_v55, %v636_v62  ;;  %v869_v1 = vpop.f32.mrb[7].mxu1 }
  0xfb   :  { %v663_v2 = vrot.slane %v656_v61, %v646_v43  ;;  %v671_v3 = vrot.slane %v664_v0, %v646_v43 }
  0xfd   :  { %v680_v5 = vcombine.low %v663_v2, %v671_v3 }
  0xff   :  { %v687_v7 = vrot.slane %v680_v5, %v678_v4 }
 0x101   :  { %v688_v8 = vcombine.low %v679_v6, %v687_v7  ;;  %v689_v9 = vcombine.high %v679_v6, %v687_v7 }
 0x103   :  { %691 = vrot.lane.b32.xlu0 %v689_v9, %s940_s0 }
 0x175   :  { %v692_v10 = vpop.permute.xlu0 %691 }
 0x176   :  { %v695_v12 = vsel %vm694_vm2, %v688_v8, %v692_v10 }
 0x177   :  { %871 = vmatpush3.msra.mxu0 %v695_v12 }
 0x178   :  { %873 = vmatmul.mubr.msk.f32.vlgmr.msra.gmra.mrb[8].mxu0 %vm698_vm3, %v696_v11 }
 0x24b   :  { %v768_v14 = vpop.f32.mrb[8].mxu0 }
 0x24c   :  { %v769_v15 = vadd.f32 %v768_v14, %v697_v13  ;;  %v874_v16 = vpop.f32.mrb[9].mxu0 }
 0x24e   :  { %773 = vst.msk [vmem:[%s1042_s4] sm:$0xff] %vm772_vm4, %v769_v15 }
 0x24f   :  { %778 = vsyncpa [#allocation3], 1 }

</bundles_post_ra>
